<compile_context>
chip_gen: v5e
topology: v5e:2x2
jax: 0.10.0
libtpu: 0.0.40
codegen_flags: <defaults>
</compile_context>

<pallas_src>
import functools

import jax
import jax.numpy as jnp
from jax.experimental import pallas as pl
from jax.experimental.pallas import tpu as pltpu

LANE = 128
SUB_BF16 = 16   # bf16 sublane packing; keeps the in-kernel reshape layout-free


def detr_select_kernel(h_ref, w_ref, b_ref, img_ref, txt_ref, out_ref, *,
                       num_classes, num_queries, threshold, cp, dp, bx):
    bblk, qp, _ = h_ref.shape
    m = bblk * qp

    # ---- matmuls on the flattened (Bblk*Qp, Dp) activation (fills MXU) ----
    h2 = h_ref[...].reshape(m, dp)                                   # bf16
    # fused class head + bbox-MLP layer 1: one MXU pass over h
    fused = jnp.dot(h2, w_ref[:, : cp + dp],
                    preferred_element_type=jnp.float32) + b_ref[:, : cp + dp]
    logits = fused[:, :cp]                                           # (M, Cp)
    x1 = jnp.maximum(fused[:, cp:], 0.0)                             # (M, Dp)

    # ---- softmax over real classes (padded lanes -> -inf) -----------------
    cls_lane = jax.lax.broadcasted_iota(jnp.int32, logits.shape, 1)
    logits = jnp.where(cls_lane < num_classes, logits, -jnp.inf)
    mx = jnp.max(logits, axis=-1, keepdims=True)
    e = jnp.exp(logits - mx)
    denom = jnp.sum(e, axis=-1, keepdims=True)                       # (M, 1)
    fg = cls_lane < (num_classes - 1)                                # drop "no object"
    e_fg_max = jnp.max(jnp.where(fg, e, 0.0), axis=-1, keepdims=True)
    # keep decision is exact (multiply form); approx recip only for scores
    keepf = (e_fg_max > threshold * denom).astype(jnp.float32)       # (M, 1)
    scores = e_fg_max * pl.reciprocal(denom, approx=True)            # (M, 1)

    # ---- bbox MLP layers 2 & 3 (weights live in the same slab) ------------
    x2 = jnp.maximum(
        jnp.dot(x1.astype(h2.dtype), w_ref[:, cp + dp: cp + 2 * dp],
                preferred_element_type=jnp.float32)
        + b_ref[:, cp + dp: cp + 2 * dp], 0.0)
    boxes = jax.nn.sigmoid(
        jnp.dot(x2.astype(h2.dtype), w_ref[:, cp + 2 * dp:],
                preferred_element_type=jnp.float32)
        + b_ref[:, cp + 2 * dp:])                                    # (M, Bx)

    # ---- CLIP cosine similarity (no normalized img materialized) ----------
    img = img_ref[...]                                               # (Bblk,Qp,DCp) f32
    txt = txt_ref[...]                                               # (Bblk,1,DCp)  f32
    dotp = jnp.sum(img * txt, axis=-1, keepdims=True)                # (Bblk,Qp,1)
    inv_i = jax.lax.rsqrt(jnp.sum(img * img, axis=-1, keepdims=True) + 1e-8)
    inv_t = jax.lax.rsqrt(jnp.sum(txt * txt, axis=-1, keepdims=True) + 1e-8)
    sim = dotp * inv_i * inv_t                                       # (Bblk,Qp,1)

    # ---- per-image masked argmax over kept real queries -------------------
    boxes3 = boxes.reshape(bblk, qp, bx)
    scores3 = scores.reshape(bblk, qp, 1)
    keepf3 = keepf.reshape(bblk, qp, 1)
    q_iota = jax.lax.broadcasted_iota(jnp.int32, sim.shape, 1)       # (Bblk,Qp,1)
    valid = jnp.logical_and(keepf3 > 0.0, q_iota < num_queries)
    masked = jnp.where(valid, sim, -jnp.inf)
    best_val = jnp.max(masked, axis=1, keepdims=True)                # (Bblk,1,1)
    best_idx = jnp.min(jnp.where(masked == best_val, q_iota, qp),
                       axis=1, keepdims=True)                        # (Bblk,1,1)
    onehot = (q_iota == best_idx).astype(jnp.float32)                # (Bblk,Qp,1)
    best_row = jnp.sum(onehot * boxes3, axis=1, keepdims=True)       # (Bblk,1,Bx)
    found = jnp.max(valid.astype(jnp.float32), axis=1, keepdims=True)  # (Bblk,1,1)

    # ---- pack: lane-dense per-query slab + one 8-row "best" tile ----------
    lane = jax.lax.broadcasted_iota(jnp.int32, boxes3.shape, 2)
    slab = jnp.where(lane < 4, boxes3, 0.0)                 # lanes 0:4  box
    slab = jnp.where(lane == 4, scores3, slab)              # lane  4    score
    slab = jnp.where(lane == 5, keepf3, slab)               # lane  5    keep
    slab = jnp.where(lane == 6, sim, slab)                  # lane  6    CLIP sim
    out_ref[:, :qp, :] = slab

    lane_b = jax.lax.broadcasted_iota(jnp.int32, best_row.shape, 2)
    brow = jnp.where(lane_b < 4, best_row, 0.0)             # lanes 0:4  best box
    brow = jnp.where(lane_b == 4, found, brow)              # lane  4    found flag
    brow = jnp.where(lane_b == 5,
                     jnp.where(found > 0.0, best_val, 0.0), brow)   # lane 5 best sim
    out_ref[:, qp:, :] = jnp.broadcast_to(brow, (bblk, 8, bx))


def _pad2(a, rows, cols):
    return jnp.pad(a, ((0, rows - a.shape[0]), (0, cols - a.shape[1])))


def detr_select(h, Wc, bc, W1, b1, W2, b2, W3, b3, img_feats, txt_feat, thr=0.7):
    B, Q, D = h.shape
    C1 = Wc.shape[1]
    DC = img_feats.shape[-1]
    Dp = pl.cdiv(D, LANE) * LANE
    Cp = pl.cdiv(C1, LANE) * LANE
    DCp = pl.cdiv(DC, LANE) * LANE
    Bx = LANE
    # pad Q to a bf16 sublane multiple; MXU fill comes from batching images.
    Qp = pl.cdiv(Q, SUB_BF16) * SUB_BF16

    # ---- choose images per grid step (VMEM-aware, keeps grid >= 2) --------
    per_img_io = (Qp * Dp * 2            # h (bf16)
                  + Qp * DCp * 4         # CLIP image feats (f32)
                  + DCp * 4              # CLIP text feat   (f32)
                  + (Qp + 8) * Bx * 4)   # packed output slab (f32)
    wtot = Cp + 2 * Dp + Bx
    weight_bytes = Dp * wtot * 2 + wtot * 4
    vmem_budget = 24 * 1024 * 1024       # conservative across v5e/v6e/v7x
    bblk = int(max(1, min(B, 16,
                          (vmem_budget - 2 * weight_bytes) // max(2 * per_img_io, 1))))
    while bblk > 1 and pl.cdiv(B, bblk) < 2:
        bblk -= 1                        # >= 2 grid steps so v7x megacore splits work
    Bp = pl.cdiv(B, bblk) * bblk

    # ---- pad & pack operands ----------------------------------------------
    h_p = jnp.pad(h, ((0, Bp - B), (0, Qp - Q), (0, Dp - D))).astype(jnp.bfloat16)
    img_p = jnp.pad(img_feats, ((0, Bp - B), (0, Qp - Q), (0, DCp - DC)))
    txt_p = jnp.pad(txt_feat, ((0, Bp - B), (0, 0), (0, DCp - DC)))
    # one bf16 weight slab [Wc | W1 | W2 | W3] and one f32 bias slab
    Wslab = jnp.concatenate(
        [_pad2(Wc, Dp, Cp), _pad2(W1, Dp, Dp), _pad2(W2, Dp, Dp), _pad2(W3, Dp, Bx)],
        axis=1).astype(jnp.bfloat16)
    bslab = jnp.concatenate(
        [_pad2(bc, 1, Cp), _pad2(b1, 1, Dp), _pad2(b2, 1, Dp), _pad2(b3, 1, Bx)],
        axis=1).astype(jnp.float32)

    kernel = functools.partial(detr_select_kernel, num_classes=C1,
                               num_queries=Q, threshold=float(thr),
                               cp=Cp, dp=Dp, bx=Bx)

    vmem_limit = int(min(48 * 2 ** 20,
                         max(16 * 2 ** 20,
                             2 * (2 * weight_bytes + 2 * bblk * per_img_io))))

    out = pl.pallas_call(
        kernel,
        out_shape=jax.ShapeDtypeStruct((Bp, Qp + 8, Bx), jnp.float32),
        grid=(Bp // bblk,),
        in_specs=[
            pl.BlockSpec((bblk, Qp, Dp), lambda b: (b, 0, 0)),     # h (bf16)
            pl.BlockSpec((Dp, wtot), lambda b: (0, 0)),            # weight slab (bf16)
            pl.BlockSpec((1, wtot), lambda b: (0, 0)),             # bias slab (f32)
            pl.BlockSpec((bblk, Qp, DCp), lambda b: (b, 0, 0)),    # CLIP image feats
            pl.BlockSpec((bblk, 1, DCp), lambda b: (b, 0, 0)),     # CLIP text feat
        ],
        out_specs=pl.BlockSpec((bblk, Qp + 8, Bx), lambda b: (b, 0, 0)),
        compiler_params=pltpu.CompilerParams(
            dimension_semantics=("parallel",),
            vmem_limit_bytes=vmem_limit),
    )(h_p, Wslab, bslab, img_p, txt_p)

    boxes = out[:B, :Q, :4]          # (B, Q, 4)  all query boxes
    scores = out[:B, :Q, 4]          # (B, Q)     per-query max class prob
    keep = out[:B, :Q, 5]            # (B, Q)     keep mask (score > thr)
    sim = out[:B, :Q, 6]             # (B, Q)     CLIP cosine similarity
    best_box = out[:B, Qp, :4]       # (B, 4)     selected box per image
    found = out[:B, Qp, 4]           # (B,)       1.0 iff any box kept
    best_sim = out[:B, Qp, 5]        # (B,)       similarity of selected box
    return best_box, boxes, scores, keep, sim, found, best_sim


def reference(h, Wc, bc, W1, b1, W2, b2, W3, b3, img_feats, txt_feat, thr):
    """Pure-JAX reference (one image) mirroring the PyTorch post-DETR forward.

    Matmul operands are cast to bf16 (f32 accumulation) to match the kernel's
    MXU numerics; all other math stays in f32 like the original module.
    """
    def mm(a, w, b):
        return jnp.dot(a.astype(jnp.bfloat16), w.astype(jnp.bfloat16),
                       preferred_element_type=jnp.float32) + b
    logits = mm(h, Wc, bc)
    probs = jax.nn.softmax(logits, axis=-1)[:, :-1]
    scores = probs.max(axis=-1)
    keep = scores > thr
    x = jnp.maximum(mm(h, W1, b1), 0.0)
    x = jnp.maximum(mm(x, W2, b2), 0.0)
    boxes = jax.nn.sigmoid(mm(x, W3, b3))
    img_n = img_feats / jnp.sqrt(jnp.sum(img_feats ** 2, -1, keepdims=True) + 1e-8)
    txt_n = txt_feat / jnp.sqrt(jnp.sum(txt_feat ** 2, -1, keepdims=True) + 1e-8)
    sim = jnp.sum(img_n * txt_n, axis=-1)
    best_idx = jnp.argmax(jnp.where(keep, sim, -jnp.inf))
    return boxes, scores, keep, sim, boxes[best_idx]


if __name__ == "__main__":
    # B images, Q object queries, D transformer hidden, C1 classes+"no object",
    # DC CLIP embedding dim (real DETR/CLIP: Q=100, D=256, C1=92, DC=512).
    B, Q, D, C1, DC = 2, 8, 32, 12, 32
    THR = 0.7
    key = jax.random.PRNGKey(0)
    ks = jax.random.split(key, 12)

    h = jax.random.normal(ks[0], (B, Q, D), jnp.float32)
    Wc = 0.3 * jax.random.normal(ks[1], (D, C1), jnp.float32)
    bc = 0.1 * jax.random.normal(ks[2], (1, C1), jnp.float32)
    bc = bc.at[0, 0].add(4.0)      # bias one class so some scores exceed 0.7
    W1 = 0.3 * jax.random.normal(ks[3], (D, D), jnp.float32)
    b1 = 0.1 * jax.random.normal(ks[4], (1, D), jnp.float32)
    W2 = 0.3 * jax.random.normal(ks[5], (D, D), jnp.float32)
    b2 = 0.1 * jax.random.normal(ks[6], (1, D), jnp.float32)
    W3 = 0.3 * jax.random.normal(ks[7], (D, 4), jnp.float32)
    b3 = 0.1 * jax.random.normal(ks[8], (1, 4), jnp.float32)
    img_feats = jax.random.normal(ks[9], (B, Q, DC), jnp.float32)   # per-crop CLIP image feats
    txt_feat = jax.random.normal(ks[10], (B, 1, DC), jnp.float32)   # CLIP text feat per image

    best_box, boxes, scores, keep, sim, found, best_sim = detr_select(
        h, Wc, bc, W1, b1, W2, b2, W3, b3, img_feats, txt_feat, THR)
    jax.block_until_ready(best_box)

    for b in range(B):
        rb, rs, rk, rsim, rbest = reference(
            h[b], Wc, bc, W1, b1, W2, b2, W3, b3, img_feats[b], txt_feat[b], THR)
        assert jnp.allclose(boxes[b], rb, atol=2e-3, rtol=2e-3), "boxes mismatch"
        # approx reciprocal in the kernel softmax -> loosened tolerance on scores
        assert jnp.allclose(scores[b], rs, atol=3e-3, rtol=3e-3), "scores mismatch"
        assert jnp.allclose(sim[b], rsim, atol=1e-4, rtol=1e-4), "sim mismatch"
        # keep is exact in the kernel; only guard queries right at the threshold
        near = jnp.abs(rs - THR) < 5e-3
        rk_f = rk.astype(jnp.float32)
        assert jnp.array_equal(jnp.where(near, rk_f, keep[b]), rk_f), "keep mismatch"
        if not bool(jnp.any(near)):
            assert bool(found[b] > 0.5) == bool(jnp.any(rk)), "found mismatch"
            assert jnp.allclose(best_box[b], rbest, atol=2e-3, rtol=2e-3), "best_box mismatch"
    print("KERNEL_OK")
</pallas_src>

<mosaic_0001>
module attributes {stable_mosaic.version = 11 : i64} {
  func.func @detr_select_kernel(%arg0: i32, %arg1: memref<1x16x128xbf16, #tpu.memory_space<vmem>>, %arg2: memref<128x512xbf16, #tpu.memory_space<vmem>>, %arg3: memref<1x512xf32, #tpu.memory_space<vmem>>, %arg4: memref<1x16x128xf32, #tpu.memory_space<vmem>>, %arg5: memref<1x1x128xf32, #tpu.memory_space<vmem>>, %arg6: memref<1x24x128xf32, #tpu.memory_space<vmem>>) attributes {dimension_semantics = [#tpu.dimension_semantics<parallel>], iteration_bounds = array<i64: 2>, scalar_prefetch = 0 : i64, scratch_operands = 0 : i64, tpu.core_type = #tpu.core_type<tc>, window_params = [{transform_indices = @transform_0, window_bounds = array<i64: 1, 16, 128>}, {pipeline_mode = #tpu.pipeline_mode<synchronous>, transform_indices = @transform_1, window_bounds = array<i64: 128, 512>}, {pipeline_mode = #tpu.pipeline_mode<synchronous>, transform_indices = @transform_2, window_bounds = array<i64: 1, 512>}, {transform_indices = @transform_3, window_bounds = array<i64: 1, 16, 128>}, {transform_indices = @transform_4, window_bounds = array<i64: 1, 1, 128>}, {transform_indices = @transform_5, window_bounds = array<i64: 1, 24, 128>}]} {
    %c0 = arith.constant 0 : index
    %c0_0 = arith.constant 0 : index
    %c0_1 = arith.constant 0 : index
    %0 = vector.load %arg1[%c0, %c0_0, %c0_1] : memref<1x16x128xbf16, #tpu.memory_space<vmem>>, vector<1x16x128xbf16>
    %1 = vector.shape_cast %0 : vector<1x16x128xbf16> to vector<16x128xbf16>
    %c0_2 = arith.constant 0 : index
    %c0_3 = arith.constant 0 : index
    %2 = vector.load %arg2[%c0_2, %c0_3] : memref<128x512xbf16, #tpu.memory_space<vmem>>, vector<128x256xbf16>
    %cst = arith.constant dense<0.000000e+00> : vector<16x256xf32>
    %3 = tpu.matmul %1, %2, %cst {dimension_numbers = #tpu.dot_dimension_numbers<[1], [0], [0], [1], [0, 0, 1, 1], [], []>} : vector<16x128xbf16>, vector<128x256xbf16>, vector<16x256xf32> -> vector<16x256xf32>
    %c0_4 = arith.constant 0 : index
    %c0_5 = arith.constant 0 : index
    %4 = vector.load %arg3[%c0_4, %c0_5] : memref<1x512xf32, #tpu.memory_space<vmem>>, vector<1x256xf32>
    %5 = vector.broadcast %4 : vector<1x256xf32> to vector<16x256xf32>
    %6 = arith.addf %3, %5 : vector<16x256xf32>
    %7 = vector.extract_strided_slice %6 {offsets = [0, 0], sizes = [16, 128], strides = [1, 1]} : vector<16x256xf32> to vector<16x128xf32>
    %8 = vector.extract_strided_slice %6 {offsets = [0, 128], sizes = [16, 128], strides = [1, 1]} : vector<16x256xf32> to vector<16x128xf32>
    %cst_6 = arith.constant 0.000000e+00 : f32
    %9 = vector.broadcast %cst_6 : f32 to vector<16x128xf32>
    %10 = arith.maximumf %8, %9 : vector<16x128xf32>
    %11 = tpu.iota {dimensions = array<i32: 1>} : vector<16x128xi32>
    %c12_i32 = arith.constant 12 : i32
    %12 = vector.broadcast %c12_i32 : i32 to vector<16x128xi32>
    %13 = arith.cmpi slt, %11, %12 : vector<16x128xi32>
    %cst_7 = arith.constant 0xFF800000 : f32
    %14 = vector.broadcast %cst_7 : f32 to vector<16x128xf32>
    %15 = arith.select %13, %7, %14 : vector<16x128xi1>, vector<16x128xf32>
    %cst_8 = arith.constant dense<0xFF800000> : vector<16xf32>
    %16 = vector.multi_reduction <maximumf>, %15, %cst_8 [1] : vector<16x128xf32> to vector<16xf32>
    %17 = vector.shape_cast %16 : vector<16xf32> to vector<16x1xf32>
    %18 = vector.broadcast %17 : vector<16x1xf32> to vector<16x128xf32>
    %19 = arith.subf %15, %18 : vector<16x128xf32>
    %20 = math.exp %19 : vector<16x128xf32>
    %cst_9 = arith.constant dense<0.000000e+00> : vector<16xf32>
    %21 = vector.multi_reduction <add>, %20, %cst_9 [1] : vector<16x128xf32> to vector<16xf32>
    %22 = vector.shape_cast %21 : vector<16xf32> to vector<16x1xf32>
    %c11_i32 = arith.constant 11 : i32
    %23 = vector.broadcast %c11_i32 : i32 to vector<16x128xi32>
    %24 = arith.cmpi slt, %11, %23 : vector<16x128xi32>
    %cst_10 = arith.constant 0.000000e+00 : f32
    %25 = vector.broadcast %cst_10 : f32 to vector<16x128xf32>
    %26 = arith.select %24, %20, %25 : vector<16x128xi1>, vector<16x128xf32>
    %cst_11 = arith.constant dense<0xFF800000> : vector<16xf32>
    %27 = vector.multi_reduction <maximumf>, %26, %cst_11 [1] : vector<16x128xf32> to vector<16xf32>
    %28 = vector.shape_cast %27 : vector<16xf32> to vector<16x1xf32>
    %cst_12 = arith.constant 0.699999988 : f32
    %29 = vector.broadcast %cst_12 : f32 to vector<16x1xf32>
    %30 = arith.mulf %29, %22 : vector<16x1xf32>
    %31 = arith.cmpf ogt, %28, %30 : vector<16x1xf32>
    %32 = arith.extui %31 : vector<16x1xi1> to vector<16x1xi32>
    %33 = arith.sitofp %32 : vector<16x1xi32> to vector<16x1xf32>
    %34 = tpu.reciprocal %22 {approx = true} : vector<16x1xf32> -> vector<16x1xf32>
    %35 = arith.mulf %28, %34 : vector<16x1xf32>
    %36 = arith.truncf %10 : vector<16x128xf32> to vector<16x128xbf16>
    %c0_13 = arith.constant 0 : index
    %c256 = arith.constant 256 : index
    %37 = vector.load %arg2[%c0_13, %c256] : memref<128x512xbf16, #tpu.memory_space<vmem>>, vector<128x128xbf16>
    %cst_14 = arith.constant dense<0.000000e+00> : vector<16x128xf32>
    %38 = tpu.matmul %36, %37, %cst_14 {dimension_numbers = #tpu.dot_dimension_numbers<[1], [0], [0], [1], [0, 0, 1, 1], [], []>} : vector<16x128xbf16>, vector<128x128xbf16>, vector<16x128xf32> -> vector<16x128xf32>
    %c0_15 = arith.constant 0 : index
    %c256_16 = arith.constant 256 : index
    %39 = vector.load %arg3[%c0_15, %c256_16] : memref<1x512xf32, #tpu.memory_space<vmem>>, vector<1x128xf32>
    %40 = vector.broadcast %39 : vector<1x128xf32> to vector<16x128xf32>
    %41 = arith.addf %38, %40 : vector<16x128xf32>
    %cst_17 = arith.constant 0.000000e+00 : f32
    %42 = vector.broadcast %cst_17 : f32 to vector<16x128xf32>
    %43 = arith.maximumf %41, %42 : vector<16x128xf32>
    %44 = arith.truncf %43 : vector<16x128xf32> to vector<16x128xbf16>
    %c0_18 = arith.constant 0 : index
    %c384 = arith.constant 384 : index
    %45 = vector.load %arg2[%c0_18, %c384] : memref<128x512xbf16, #tpu.memory_space<vmem>>, vector<128x128xbf16>
    %cst_19 = arith.constant dense<0.000000e+00> : vector<16x128xf32>
    %46 = tpu.matmul %44, %45, %cst_19 {dimension_numbers = #tpu.dot_dimension_numbers<[1], [0], [0], [1], [0, 0, 1, 1], [], []>} : vector<16x128xbf16>, vector<128x128xbf16>, vector<16x128xf32> -> vector<16x128xf32>
    %c0_20 = arith.constant 0 : index
    %c384_21 = arith.constant 384 : index
    %47 = vector.load %arg3[%c0_20, %c384_21] : memref<1x512xf32, #tpu.memory_space<vmem>>, vector<1x128xf32>
    %48 = vector.broadcast %47 : vector<1x128xf32> to vector<16x128xf32>
    %49 = arith.addf %46, %48 : vector<16x128xf32>
    %50 = arith.negf %49 : vector<16x128xf32>
    %51 = math.exp %50 : vector<16x128xf32>
    %cst_22 = arith.constant 1.000000e+00 : f32
    %52 = vector.broadcast %cst_22 : f32 to vector<16x128xf32>
    %53 = arith.addf %52, %51 : vector<16x128xf32>
    %54 = arith.divf %52, %53 : vector<16x128xf32>
    %c0_23 = arith.constant 0 : index
    %c0_24 = arith.constant 0 : index
    %c0_25 = arith.constant 0 : index
    %55 = vector.load %arg4[%c0_23, %c0_24, %c0_25] : memref<1x16x128xf32, #tpu.memory_space<vmem>>, vector<1x16x128xf32>
    %c0_26 = arith.constant 0 : index
    %c0_27 = arith.constant 0 : index
    %c0_28 = arith.constant 0 : index
    %56 = vector.load %arg5[%c0_26, %c0_27, %c0_28] : memref<1x1x128xf32, #tpu.memory_space<vmem>>, vector<1x1x128xf32>
    %57 = vector.broadcast %56 : vector<1x1x128xf32> to vector<1x16x128xf32>
    %58 = arith.mulf %55, %57 : vector<1x16x128xf32>
    %cst_29 = arith.constant dense<0.000000e+00> : vector<1x16xf32>
    %59 = vector.multi_reduction <add>, %58, %cst_29 [2] : vector<1x16x128xf32> to vector<1x16xf32>
    %60 = vector.shape_cast %59 : vector<1x16xf32> to vector<1x16x1xf32>
    %61 = arith.mulf %55, %55 : vector<1x16x128xf32>
    %cst_30 = arith.constant dense<0.000000e+00> : vector<1x16xf32>
    %62 = vector.multi_reduction <add>, %61, %cst_30 [2] : vector<1x16x128xf32> to vector<1x16xf32>
    %63 = vector.shape_cast %62 : vector<1x16xf32> to vector<1x16x1xf32>
    %cst_31 = arith.constant 9.99999993E-9 : f32
    %64 = vector.broadcast %cst_31 : f32 to vector<1x16x1xf32>
    %65 = arith.addf %63, %64 : vector<1x16x1xf32>
    %66 = math.rsqrt %65 : vector<1x16x1xf32>
    %67 = arith.mulf %56, %56 : vector<1x1x128xf32>
    %cst_32 = arith.constant dense<0.000000e+00> : vector<1x1xf32>
    %68 = vector.multi_reduction <add>, %67, %cst_32 [2] : vector<1x1x128xf32> to vector<1x1xf32>
    %69 = vector.shape_cast %68 : vector<1x1xf32> to vector<1x1x1xf32>
    %cst_33 = arith.constant 9.99999993E-9 : f32
    %70 = vector.broadcast %cst_33 : f32 to vector<1x1x1xf32>
    %71 = arith.addf %69, %70 : vector<1x1x1xf32>
    %72 = math.rsqrt %71 : vector<1x1x1xf32>
    %73 = arith.mulf %60, %66 : vector<1x16x1xf32>
    %74 = vector.broadcast %72 : vector<1x1x1xf32> to vector<1x16x1xf32>
    %75 = arith.mulf %73, %74 : vector<1x16x1xf32>
    %76 = vector.shape_cast %54 : vector<16x128xf32> to vector<1x16x128xf32>
    %77 = vector.shape_cast %35 : vector<16x1xf32> to vector<1x16x1xf32>
    %78 = vector.shape_cast %33 : vector<16x1xf32> to vector<1x16x1xf32>
    %79 = tpu.iota {dimensions = array<i32: 1>} : vector<1x16x1xi32>
    %cst_34 = arith.constant 0.000000e+00 : f32
    %80 = vector.broadcast %cst_34 : f32 to vector<1x16x1xf32>
    %81 = arith.cmpf ogt, %78, %80 : vector<1x16x1xf32>
    %c8_i32 = arith.constant 8 : i32
    %82 = vector.broadcast %c8_i32 : i32 to vector<1x16x1xi32>
    %83 = arith.cmpi slt, %79, %82 : vector<1x16x1xi32>
    %84 = arith.andi %81, %83 : vector<1x16x1xi1>
    %cst_35 = arith.constant 0xFF800000 : f32
    %85 = vector.broadcast %cst_35 : f32 to vector<1x16x1xf32>
    %86 = arith.select %84, %75, %85 : vector<1x16x1xi1>, vector<1x16x1xf32>
    %cst_36 = arith.constant dense<0xFF800000> : vector<1x1xf32>
    %87 = vector.multi_reduction <maximumf>, %86, %cst_36 [1] : vector<1x16x1xf32> to vector<1x1xf32>
    %88 = vector.shape_cast %87 : vector<1x1xf32> to vector<1x1x1xf32>
    %89 = vector.broadcast %88 : vector<1x1x1xf32> to vector<1x16x1xf32>
    %90 = arith.cmpf oeq, %86, %89 : vector<1x16x1xf32>
    %c16_i32 = arith.constant 16 : i32
    %91 = vector.broadcast %c16_i32 : i32 to vector<1x16x1xi32>
    %92 = arith.select %90, %79, %91 : vector<1x16x1xi1>, vector<1x16x1xi32>
    %cst_37 = arith.constant dense<2147483647> : vector<1x1xi32>
    %93 = vector.multi_reduction <minsi>, %92, %cst_37 [1] : vector<1x16x1xi32> to vector<1x1xi32>
    %94 = vector.shape_cast %93 : vector<1x1xi32> to vector<1x1x1xi32>
    %95 = vector.broadcast %94 : vector<1x1x1xi32> to vector<1x16x1xi32>
    %96 = arith.cmpi eq, %79, %95 : vector<1x16x1xi32>
    %97 = arith.extui %96 : vector<1x16x1xi1> to vector<1x16x1xi32>
    %98 = arith.sitofp %97 : vector<1x16x1xi32> to vector<1x16x1xf32>
    %99 = vector.broadcast %98 : vector<1x16x1xf32> to vector<1x16x128xf32>
    %100 = arith.mulf %99, %76 : vector<1x16x128xf32>
    %cst_38 = arith.constant dense<0.000000e+00> : vector<1x128xf32>
    %101 = vector.multi_reduction <add>, %100, %cst_38 [1] : vector<1x16x128xf32> to vector<1x128xf32>
    %102 = vector.shape_cast %101 : vector<1x128xf32> to vector<1x1x128xf32>
    %103 = arith.extui %84 : vector<1x16x1xi1> to vector<1x16x1xi32>
    %104 = arith.sitofp %103 : vector<1x16x1xi32> to vector<1x16x1xf32>
    %cst_39 = arith.constant dense<0xFF800000> : vector<1x1xf32>
    %105 = vector.multi_reduction <maximumf>, %104, %cst_39 [1] : vector<1x16x1xf32> to vector<1x1xf32>
    %106 = vector.shape_cast %105 : vector<1x1xf32> to vector<1x1x1xf32>
    %107 = tpu.iota {dimensions = array<i32: 2>} : vector<1x16x128xi32>
    %c4_i32 = arith.constant 4 : i32
    %108 = vector.broadcast %c4_i32 : i32 to vector<1x16x128xi32>
    %109 = arith.cmpi slt, %107, %108 : vector<1x16x128xi32>
    %cst_40 = arith.constant 0.000000e+00 : f32
    %110 = vector.broadcast %cst_40 : f32 to vector<1x16x128xf32>
    %111 = arith.select %109, %76, %110 : vector<1x16x128xi1>, vector<1x16x128xf32>
    %c4_i32_41 = arith.constant 4 : i32
    %112 = vector.broadcast %c4_i32_41 : i32 to vector<1x16x128xi32>
    %113 = arith.cmpi eq, %107, %112 : vector<1x16x128xi32>
    %114 = vector.shape_cast %77 : vector<1x16x1xf32> to vector<1x16x1xf32>
    %115 = vector.broadcast %114 : vector<1x16x1xf32> to vector<1x16x128xf32>
    %116 = arith.select %113, %115, %111 : vector<1x16x128xi1>, vector<1x16x128xf32>
    %c5_i32 = arith.constant 5 : i32
    %117 = vector.broadcast %c5_i32 : i32 to vector<1x16x128xi32>
    %118 = arith.cmpi eq, %107, %117 : vector<1x16x128xi32>
    %119 = vector.shape_cast %78 : vector<1x16x1xf32> to vector<1x16x1xf32>
    %120 = vector.broadcast %119 : vector<1x16x1xf32> to vector<1x16x128xf32>
    %121 = arith.select %118, %120, %116 : vector<1x16x128xi1>, vector<1x16x128xf32>
    %c6_i32 = arith.constant 6 : i32
    %122 = vector.broadcast %c6_i32 : i32 to vector<1x16x128xi32>
    %123 = arith.cmpi eq, %107, %122 : vector<1x16x128xi32>
    %124 = vector.shape_cast %75 : vector<1x16x1xf32> to vector<1x16x1xf32>
    %125 = vector.broadcast %124 : vector<1x16x1xf32> to vector<1x16x128xf32>
    %126 = arith.select %123, %125, %121 : vector<1x16x128xi1>, vector<1x16x128xf32>
    %c0_42 = arith.constant 0 : index
    %c0_43 = arith.constant 0 : index
    %c0_44 = arith.constant 0 : index
    %127 = vector.load %arg6[%c0_42, %c0_43, %c0_44] : memref<1x24x128xf32, #tpu.memory_space<vmem>>, vector<1x16x128xf32>
    tpu.vector_store %arg6[%c0_42, %c0_43, %c0_44], %126 {strides = array<i32>} : memref<1x24x128xf32, #tpu.memory_space<vmem>>, vector<1x16x128xf32>,
    %128 = tpu.iota {dimensions = array<i32: 2>} : vector<1x1x128xi32>
    %c4_i32_45 = arith.constant 4 : i32
    %129 = vector.broadcast %c4_i32_45 : i32 to vector<1x1x128xi32>
    %130 = arith.cmpi slt, %128, %129 : vector<1x1x128xi32>
    %cst_46 = arith.constant 0.000000e+00 : f32
    %131 = vector.broadcast %cst_46 : f32 to vector<1x1x128xf32>
    %132 = arith.select %130, %102, %131 : vector<1x1x128xi1>, vector<1x1x128xf32>
    %c4_i32_47 = arith.constant 4 : i32
    %133 = vector.broadcast %c4_i32_47 : i32 to vector<1x1x128xi32>
    %134 = arith.cmpi eq, %128, %133 : vector<1x1x128xi32>
    %135 = vector.shape_cast %106 : vector<1x1x1xf32> to vector<1x1x1xf32>
    %136 = vector.broadcast %135 : vector<1x1x1xf32> to vector<1x1x128xf32>
    %137 = arith.select %134, %136, %132 : vector<1x1x128xi1>, vector<1x1x128xf32>
    %c5_i32_48 = arith.constant 5 : i32
    %138 = vector.broadcast %c5_i32_48 : i32 to vector<1x1x128xi32>
    %139 = arith.cmpi eq, %128, %138 : vector<1x1x128xi32>
    %cst_49 = arith.constant 0.000000e+00 : f32
    %140 = vector.broadcast %cst_49 : f32 to vector<1x1x1xf32>
    %141 = arith.cmpf ogt, %106, %140 : vector<1x1x1xf32>
    %cst_50 = arith.constant 0.000000e+00 : f32
    %142 = vector.broadcast %cst_50 : f32 to vector<1x1x1xf32>
    %143 = arith.select %141, %88, %142 : vector<1x1x1xi1>, vector<1x1x1xf32>
    %144 = vector.shape_cast %143 : vector<1x1x1xf32> to vector<1x1x1xf32>
    %145 = vector.broadcast %144 : vector<1x1x1xf32> to vector<1x1x128xf32>
    %146 = arith.select %139, %145, %137 : vector<1x1x128xi1>, vector<1x1x128xf32>
    %147 = vector.shape_cast %146 : vector<1x1x128xf32> to vector<1x1x128xf32>
    %148 = vector.broadcast %147 : vector<1x1x128xf32> to vector<1x8x128xf32>
    %c0_51 = arith.constant 0 : index
    %c16 = arith.constant 16 : index
    %c0_52 = arith.constant 0 : index
    %149 = vector.load %arg6[%c0_51, %c16, %c0_52] : memref<1x24x128xf32, #tpu.memory_space<vmem>>, vector<1x8x128xf32>
    tpu.vector_store %arg6[%c0_51, %c16, %c0_52], %148 {strides = array<i32>} : memref<1x24x128xf32, #tpu.memory_space<vmem>>, vector<1x8x128xf32>,
    return
  }
  func.func @transform_0(%arg0: i32) -> (i32, i32, i32) {
    %c0_i32 = arith.constant 0 : i32
    %c0_i32_0 = arith.constant 0 : i32
    %c0_i32_1 = arith.constant 0 : i32
    return %arg0, %c0_i32, %c0_i32_0 : i32, i32, i32
  }
  func.func @transform_1(%arg0: i32) -> (i32, i32) {
    %c0_i32 = arith.constant 0 : i32
    %c0_i32_0 = arith.constant 0 : i32
    %c0_i32_1 = arith.constant 0 : i32
    return %c0_i32, %c0_i32_0 : i32, i32
  }
  func.func @transform_2(%arg0: i32) -> (i32, i32) {
    %c0_i32 = arith.constant 0 : i32
    %c0_i32_0 = arith.constant 0 : i32
    %c0_i32_1 = arith.constant 0 : i32
    return %c0_i32, %c0_i32_0 : i32, i32
  }
  func.func @transform_3(%arg0: i32) -> (i32, i32, i32) {
    %c0_i32 = arith.constant 0 : i32
    %c0_i32_0 = arith.constant 0 : i32
    %c0_i32_1 = arith.constant 0 : i32
    return %arg0, %c0_i32, %c0_i32_0 : i32, i32, i32
  }
  func.func @transform_4(%arg0: i32) -> (i32, i32, i32) {
    %c0_i32 = arith.constant 0 : i32
    %c0_i32_0 = arith.constant 0 : i32
    %c0_i32_1 = arith.constant 0 : i32
    return %arg0, %c0_i32, %c0_i32_0 : i32, i32, i32
  }
  func.func @transform_5(%arg0: i32) -> (i32, i32, i32) {
    %c0_i32 = arith.constant 0 : i32
    %c0_i32_0 = arith.constant 0 : i32
    %c0_i32_1 = arith.constant 0 : i32
    return %arg0, %c0_i32, %c0_i32_0 : i32, i32, i32
  }
}

</mosaic_0001>

<bundles_post_ra>
// kernel: tpu_custom_call.1
= control target key start
LH: loop header
LB: loop body
LE: loop exit
PB: predicated region body
PF: predicated region fallthrough
CT: control target
= control target key end

     0   :  { %s1826_s0 = inlined_call_operand.hbm [shape: bf16[2,16,128], index: 0, kind: input, shape index: {}]   ;;  %s1827_s1 = inlined_call_operand.hbm [shape: bf16[128,512], index: 1, kind: input, shape index: {}]   ;;  %s1828_s2 = inlined_call_operand.hbm [shape: f32[1,512], index: 2, kind: input, shape index: {}]   ;;  %s1829_s3 = inlined_call_operand.hbm [shape: f32[2,16,128], index: 3, kind: input, shape index: {}]   ;;  %s1830_s4 = inlined_call_operand.vmem [shape: f32[2,1,128], index: 4, kind: input, shape index: {}]   ;;  %s1831_s5 = inlined_call_operand.hbm [shape: f32[2,24,128], index: 5, kind: output, shape index: {}]  }
   0x1   :  { %1832 = sst [smem:[#allocation16_spill]] %s1826_s0 }
   0x2   :  { %1833 = sst [smem:[#allocation17_spill]] %s1827_s1 }
   0x3   :  { %1834 = sst [smem:[#allocation18_spill]] %s1828_s2 }
   0x4   :  { %10 = vsyncpa [#allocation3], 0 }
   0x5   :  { %12 = vsyncpa [#allocation3 + $0x1], 0 }
   0x6   :  { %13 = vsyncpa [#allocation6], 0 }
   0x7   :  { %14 = vsyncpa [#allocation9], 0 }
   0x8   :  { %16 = vsyncpa [#allocation9 + $0x1], 0 }
   0x9   :  { %17 = vsyncpa [#allocation4], 0 }
   0xa   :  { %19 = vsyncpa [#allocation4 + $0x1], 0  ;;  %s1535_s18 = smov 0   ;;  %s1537_s19 = smov 0  }
   0xb   :  { %s1539_s20 = smov 0   ;;  %s1541_s21 = smov 0  }
   0xc LB: > { %s1556_s22 = sadd.s32 4294967295, %s1492_s21   ;;  %s996_s23 = sadd.s32 4294967294, %s1492_s21   ;;  %s1492_s21 = sphi %s1541_s21, %s1853_s21   ;;  %s1488_s20 = sphi %s1539_s20, %s1852_s20   ;;  %s1484_s19 = sphi %s1537_s19, %s1851_s19   ;;  %s1480_s18 = sphi %s1535_s18, %s1850_s18  }
   0xd   : > { %p45_p0 = scmp.ne.s32.totalorder %s1484_s19, %s1480_s18  ;;  %p46_p1 = scmp.eq.s32.totalorder %s1556_s22, 0 }
   0xe   : > { %p163_p2 = scmp.eq.s32.totalorder %s1556_s22, 1  ;;  %p169_p3 = scmp.eq.s32.totalorder %s996_s23, 1 }
   0xf   : > { %p1565_p4 = por %p46_p1, %p45_p0  ;;  %p997_p5 = scmp.ge.s32.totalorder %s1492_s21, 1 }
  0x10   : > { %p1570_p6 = por %p169_p3, %p45_p0  ;;  %p176_p7 = scmp.lt.s32.totalorder %s1492_s21, 3 }
  0x11   : > { %s1837_s1 = sld [smem:[#allocation17_spill]]  ;;  %s1494_s30 = smov [#allocation5]  }
  0x12   : > { %p1578_p8 = pnand %p997_p5, %p176_p7  ;;  %s189_s6 = sshll.u32 %s1494_s30, 4  ;;  %s190_s6 = int_to_ptr.vmem [resolvable:$true] %s189_s6 }
  0x13   : > { %s1839_s2 = sld [smem:[#allocation18_spill]]  ;;  %s1495_s10 = smov 256  }
  0x14   : > { %p1206_p9 = pneg %p1578_p8  ;;  %s1496_s11 = smov 16  }
  0x15   : > { %s1497_s12 = smov [#allocation7]   ;;  %s1591_s14 = sadd.s32 1, %s1492_s21  }
  0x16   : > { %p1207_p10 = pnand %p1206_p9, %p46_p1  ;;  %s204_s13 = sshll.u32 %s1497_s12, 4  ;;  %s205_s13 = int_to_ptr.vmem [resolvable:$true] %s204_s13 }
  0x17   : > { %s187_s28 = sshll.u32 %s1837_s1, 4  ;;  %s32_s15 = sadd.s32 1, %s1488_s20  ;;  %s188_s28 = int_to_ptr.hbm [resolvable:$true] %s187_s28 }
  0x18   : > { %1209 = dma.hbm_to_vmem [thread:$0]  (!%p1207_p10), %s188_s28, 4096, %s190_s6, [#allocation6], %s1495_s10, %s1495_s10, %s1496_s11  }
  0x19   : > { %s202_s9 = sshll.u32 %s1839_s2, 4  ;;  %s29_s16 = ssub.s32 %s1492_s21, %s1591_s14  ;;  %s203_s9 = int_to_ptr.hbm [resolvable:$true] %s202_s9 }
  0x1a   : > { %1212 = dma.hbm_to_vmem [thread:$0]  (!%p1207_p10), %s203_s9, 64, %s205_s13, [#allocation6]  }
  0x1b   : > { %p39_p12 = scmp.ne.s32.totalorder %s1488_s20, %s1484_s19  ;;  %p30_p13 = scmp.eq.s32.totalorder %s29_s16, 0 }
  0x1c   : > { %p40_p0 = scmp.eq.s32.totalorder %s1492_s21, 0  ;;  %p1226_p5 = scmp.lt.s32.totalorder %s1492_s21, 2 }
  0x1d   : > { %p1601_p3 = por %p163_p2, %p39_p12  ;;  %s1610_s26 = sand.u32 1, %s1488_s20  }
  0x1e   : > { %s1607_s23 = scalar_select %p30_p13, %s1488_s20, %s32_s15  }
  0x1f   : > { %p41_p7 = por %p40_p0, %p39_p12  ;;  %s1001_s27 = sshll.u32 %s1610_s26, 3 }
  0x20   : > { %1841 = sst [smem:[#allocation15_spill]] %s1607_s23  ;;  %s1155_s28 = sshll.u32 %s1492_s21, 3 }
  0x21   : > { %s1842_s0 = sld [smem:[#allocation16_spill]]  ;;  %s219_s8 = scalar_lea.vmem [#allocation2], %s1001_s27 }
  0x22   : > { %s227_s9 = sshll.u32 %s219_s8, 4  ;;  %p1617_p2 = pnand %p1226_p5, %p41_p7  ;;  %s228_s9 = int_to_ptr.vmem [resolvable:$true] %s227_s9 }
  0x23   : > { %s216_s12 = scalar_lea.sflag [#allocation3], %s1610_s26 }
  0x24   : > { %p1362_p10 = pneg %p1617_p2 }
  0x27   : > { %s224_s7 = scalar_lea.hbm %s1842_s0, %s1155_s28  ;;  %s1365_s28 = scalar_lea.hbm %s1842_s0, 16 }
  0x28   : > { %s225_s10 = sshll.u32 %s224_s7, 4  ;;  %s226_s10 = int_to_ptr.hbm [resolvable:$true] %s225_s10 }
  0x29   : > { %s1358_s13 = sshra.s32 %s226_s10, 4  ;;  %s1359_s13 = int_to_ptr.hbm [resolvable:$true] %s1358_s13 }
  0x2a   : > { %s1360_s15 = scalar_lea.hbm %s1359_s13, 8  ;;  %p1366_p0 = scmp.lt.s32.totalorder %s1359_s13, %s1842_s0 }
  0x2b   : > { %p1361_p9 = scmp.ne.s32.totalorder %s1359_s13, %s1360_s15  ;;  %p1367_p5 = scmp.lt.s32.totalorder %s1365_s28, %s1360_s15 }
  0x2d   : > { %p1363_p12 = pnand %p1362_p10, %p1361_p9  ;;  %p1368_p7 = por %p1367_p5, %p1366_p0 }
  0x2f   : > { %p1364_p13 = pneg %p1363_p12 }
  0x31   : > { %p1369_p11 = pnand %p1368_p7, %p1364_p13 }
  0x33   : > { %1372 = shalt.err (!%p1369_p11)
}
  0x34   : > { %s1498_s7 = smov 64   ;;  %s1499_s8 = smov 4  }
  0x35   : > { %1216 = dma.hbm_to_vmem [thread:$0]  (!%p1617_p2), %s226_s10, 128, %s228_s9, %s216_s12, %s1498_s7, %s1498_s7, %s1499_s8  }
  0x36   : > { %s1004_s1 = sshll.u32 %s1610_s26, 4  ;;  %s1156_s16 = sshll.u32 %s1492_s21, 4 }
  0x37   : > { %s246_s30 = scalar_lea.hbm %s1829_s3, %s1156_s16  ;;  %s241_s15 = scalar_lea.vmem [#allocation8], %s1004_s1 }
  0x38   : > { %s247_s13 = sshll.u32 %s246_s30, 4  ;;  %s249_s28 = sshll.u32 %s241_s15, 4  ;;  %s248_s13 = int_to_ptr.hbm [resolvable:$true] %s247_s13  ;;  %s250_s28 = int_to_ptr.vmem [resolvable:$true] %s249_s28 }
  0x39   : > { %s238_s6 = scalar_lea.sflag [#allocation9], %s1610_s26  ;;  %s1388_s0 = sshra.s32 %s248_s13, 4  ;;  %s1389_s0 = int_to_ptr.hbm [resolvable:$true] %s1388_s0 }
  0x3a   : > { %s1390_s23 = scalar_lea.hbm %s1389_s0, 16  ;;  %s1395_s12 = scalar_lea.hbm %s1829_s3, 32 }
  0x3b   : > { %p1391_p11 = scmp.ne.s32.totalorder %s1389_s0, %s1390_s23  ;;  %p1396_p13 = scmp.lt.s32.totalorder %s1389_s0, %s1829_s3 }
  0x3c   : > { %p1397_p0 = scmp.lt.s32.totalorder %s1395_s12, %s1390_s23 }
  0x3d   : > { %p1393_p9 = pnand %p1391_p11, %p1362_p10 }
  0x3e   : > { %p1398_p5 = por %p1397_p0, %p1396_p13 }
  0x3f   : > { %p1394_p12 = pneg %p1393_p9 }
  0x41   : > { %p1399_p7 = pnand %p1398_p5, %p1394_p12 }
  0x43   : > { %1402 = shalt.err (!%p1399_p7)
}
  0x44   : > { %s1500_s1 = smov 128   ;;  %s1501_s26 = smov 8  }
  0x45   : > { %1219 = dma.hbm_to_vmem [thread:$0]  (!%p1617_p2), %s248_s13, 256, %s250_s28, %s238_s6, %s1500_s1, %s1500_s1, %s1501_s26  }
  0x46   : > { %267 = sbr.rel (%p1578_p8) target bundleno = 595 (0x253), region = 40  ;;  %s1655_s8 = sand.u32 (!%p1578_p8), 1, %s1484_s19  }
  0x47   : > { %s1008_s16 = sshll.u32 (!%p1578_p8), %s1655_s8, 3  ;;  %s270_s0 = scalar_lea.sflag (!%p1578_p8), [#allocation3], %s1655_s8 }
  0x48   : > { %s1659_s23 = scalar_lea.vmem (!%p1578_p8), [#allocation2], %s1008_s16 }
  0x4b   : > { %1463 = dma.done.wait (%p1565_p4), %s270_s0, 128  }
  0x4c   : > { %1465 = vsyncadd (%p1565_p4), %s270_s0, 4294967168 }
  0x4d   : > { %1467 = dma.done.wait (%p46_p1), [#allocation6], 4160  }
  0x4e   : > { %1469 = vsyncadd (%p46_p1), [#allocation6], 4294963136  ;;  %s1011_s29 = sshll.u32 %s1655_s8, 4  ;;  %s290_s11 = scalar_lea.sflag [#allocation9], %s1655_s8 }
  0x4f   : > { %s1671_s27 = scalar_lea.vmem [#allocation8], %s1011_s29 }
  0x50   : > { %1471 = dma.done.wait (%p1565_p4), %s290_s11, 256  }
  0x51   : > { %1473 = vsyncadd (%p1565_p4), %s290_s11, 4294967040  ;;  %v1074_v0 = vld [vmem:[#allocation5 + $0xe0] sm:$0xf]  ;;  %v1173_v1 = vld [vmem:[#allocation5 + $0xec] sm:$0xf0]  ;;  %p329_p1 = scmp.lt.s32.totalorder %s1556_s22, 1 }
  0x52   : > { %v1172_v2 = vld [vmem:[#allocation5 + $0xe4] sm:$0xf]  ;;  %v1075_v3 = vor.u32 %v1173_v1, %v1074_v0  ;;  %v1076_v4 = vld [vmem:[#allocation5 + $0xf0] sm:$0xf0]  ;;  %v1066_v5 = vld [vmem:[#allocation5 + $0xc0] sm:$0xf] }
  0x53   : > { %v1171_v6 = vld [vmem:[#allocation5 + $0xcc] sm:$0xf0]  ;;  %v1079_v7 = vor.u32 %v1172_v2, %v1076_v4  ;;  %v1170_v8 = vld [vmem:[#allocation5 + $0xc4] sm:$0xf]  ;;  %v1068_v9 = vld [vmem:[#allocation5 + $0xd0] sm:$0xf0] }
  0x54   : > { %442 = vmatpush.bf16.msra.mxu0 %v1075_v3  ;;  %v1067_v10 = vor.u32 %v1171_v6, %v1066_v5  ;;  %v1071_v11 = vor.u32 %v1170_v8, %v1068_v9  ;;  %v1058_v12 = vld [vmem:[#allocation5 + $0xa0] sm:$0xf]  ;;  %v1169_v13 = vld [vmem:[#allocation5 + $0xac] sm:$0xf0]  ;;  %v1168_v14 = vld [vmem:[#allocation5 + $0xa4] sm:$0xf] }
  0x55   : > { %456 = vmatpush.bf16.msra.mxu1 %v1079_v7  ;;  %v1060_v15 = vld [vmem:[#allocation5 + $0xb0] sm:$0xf0]  ;;  %v1059_v16 = vor.u32 %v1169_v13, %v1058_v12  ;;  %v1050_v18 = vld [vmem:[#allocation5 + $0x80] sm:$0xf]  ;;  %v1167_v19 = vld [vmem:[#allocation5 + $0x8c] sm:$0xf0]  ;;  %v472_v12 = vlaneseq }
  0x56   : > { %v1063_v17 = vor.u32 %v1168_v14, %v1060_v15  ;;  %v1166_v20 = vld [vmem:[#allocation5 + $0x84] sm:$0xf]  ;;  %v1052_v21 = vld [vmem:[#allocation5 + $0x90] sm:$0xf0]  ;;  %v1051_v22 = vor.u32 %v1167_v19, %v1050_v18  ;;  %v1112_v23 = vld [vmem:[#allocation5 + $0xe8] sm:$0xf] }
  0x57   : > { %v1181_v24 = vld [vmem:[#allocation5 + $0xf4] sm:$0xf0]  ;;  %v1108_v25 = vld [vmem:[#allocation5 + $0xc8] sm:$0xf]  ;;  %v1055_v26 = vor.u32 %v1166_v20, %v1052_v21  ;;  %v1042_v27 = vld [vmem:[#allocation5 + $0x60] sm:$0xf] }
  0x58   : > { %443 = vmatpush.bf16.msra.mxu0 %v1067_v10  ;;  %v1165_v28 = vld [vmem:[#allocation5 + $0x6c] sm:$0xf0]  ;;  %v1113_v29 = vor.u32 %v1181_v24, %v1112_v23  ;;  %v1180_v30 = vld [vmem:[#allocation5 + $0xd4] sm:$0xf0]  ;;  %v1164_v31 = vld [vmem:[#allocation5 + $0x64] sm:$0xf] }
  0x59   : > { %457 = vmatpush.bf16.msra.mxu1 %v1071_v11  ;;  %v1044_v32 = vld [vmem:[#allocation5 + $0x70] sm:$0xf0]  ;;  %v1109_v33 = vor.u32 %v1180_v30, %v1108_v25  ;;  %v1043_v34 = vor.u32 %v1165_v28, %v1042_v27  ;;  %v1104_v35 = vld [vmem:[#allocation5 + $0xa8] sm:$0xf]  ;;  %v1179_v36 = vld [vmem:[#allocation5 + $0xb4] sm:$0xf0] }
  0x5a   : > { %579 = vmatpush.bf16.msra.mxu2 %v1113_v29  ;;  %v1047_v37 = vor.u32 %v1164_v31, %v1044_v32  ;;  %v1034_v38 = vld [vmem:[#allocation5 + $0x40] sm:$0xf]  ;;  %v1163_v39 = vld [vmem:[#allocation5 + $0x4c] sm:$0xf0]  ;;  %v1162_v40 = vld [vmem:[#allocation5 + $0x44] sm:$0xf]  ;;  %v1105_v42 = vor.u32 %v1179_v36, %v1104_v35 }
  0x5b   : > { %v1036_v41 = vld [vmem:[#allocation5 + $0x50] sm:$0xf0]  ;;  %v1035_v43 = vor.u32 %v1163_v39, %v1034_v38  ;;  %v1100_v44 = vld [vmem:[#allocation5 + $0x88] sm:$0xf]  ;;  %v1178_v45 = vld [vmem:[#allocation5 + $0x94] sm:$0xf0] }
  0x5c   : > { %444 = vmatpush.bf16.msra.mxu0 %v1059_v16  ;;  %v1039_v46 = vor.u32 %v1162_v40, %v1036_v41  ;;  %v1026_v47 = vld [vmem:[#allocation5 + $0x20] sm:$0xf]  ;;  %v1161_v48 = vld [vmem:[#allocation5 + $0x2c] sm:$0xf0]  ;;  %v1160_v49 = vld [vmem:[#allocation5 + $0x24] sm:$0xf]  ;;  %v1101_v51 = vor.u32 %v1178_v45, %v1100_v44 }
  0x5d   : > { %458 = vmatpush.bf16.msra.mxu1 %v1063_v17  ;;  %v1028_v50 = vld [vmem:[#allocation5 + $0x30] sm:$0xf0]  ;;  %v1027_v52 = vor.u32 %v1161_v48, %v1026_v47  ;;  %v1018_v54 = vld [vmem:[#allocation5] sm:$0xf]  ;;  %v1159_v55 = vld [vmem:[#allocation5 + $0xc] sm:$0xf0] }
  0x5e   : > { %580 = vmatpush.bf16.msra.mxu2 %v1109_v33  ;;  %v1031_v53 = vor.u32 %v1160_v49, %v1028_v50  ;;  %v1158_v56 = vld [vmem:[#allocation5 + $0x4] sm:$0xf]  ;;  %v1020_v57 = vld [vmem:[#allocation5 + $0x10] sm:$0xf0]  ;;  %v1019_v58 = vor.u32 %v1159_v55, %v1018_v54  ;;  %s330_s24 = scalar_select %p329_p1, %s1556_s22, 1  ;;  %vm757_vm0 = vcmask 1040384  }
  0x5f   : > { %v1023_v59 = vor.u32 %v1158_v56, %v1020_v57  ;;  %v1157_v60 = vld [vmem:[%s1659_s23] sm:$0xff]  ;;  %v1096_v61 = vld [vmem:[#allocation5 + $0x68] sm:$0xf]  ;;  %v350_v13 = vld [vmem:[#allocation7] sm:$0x3]  ;;  %v1687_v14 = vand.u32 127, %v472_v12 }
  0x60   : > { %445 = vmatpush.bf16.msra.mxu0 %v1051_v22  ;;  %v1177_v62 = vld [vmem:[#allocation5 + $0x74] sm:$0xf0]  ;;  %s1683_s15 = scalar_lea.vmem %s1830_s4, %s330_s24  ;;  %v1092_v2 = vld [vmem:[#allocation5 + $0x48] sm:$0xf]  ;;  %v352_v15 = vperm.slane %v350_v13, 0  ;;  %v353_v20 = vperm.slane %v350_v13, 1 }
  0x61   : > { %459 = vmatpush.bf16.msra.mxu1 %v1055_v26  ;;  %v1097_v63 = vor.u32 %v1177_v62, %v1096_v61  ;;  %v718_v0 = vld [vmem:[%s1683_s15] sm:$0x1]  ;;  %v1176_v3 = vld [vmem:[#allocation5 + $0x54] sm:$0xf0]  ;;  %v1088_v6 = vld [vmem:[#allocation5 + $0x28] sm:$0xf] }
  0x62   : > { %581 = vmatpush.bf16.msra.mxu2 %v1105_v42  ;;  %v756_v1 = vmul.f32 %v718_v0, %v718_v0  ;;  %v1093_v4 = vor.u32 %v1176_v3, %v1092_v2  ;;  %v1175_v7 = vld [vmem:[#allocation5 + $0x34] sm:$0xf0]  ;;  %v1084_v9 = vld [vmem:[#allocation5 + $0x8] sm:$0xf]  ;;  %vm474_vm1 = vcmp.lt.s32.totalorder %v1687_v14, 12  ;;  %v717_v29 = vld [vmem:[%s1671_s27 + $0x8] sm:$0xff] }
  0x63   : > { %v1089_v8 = vor.u32 %v1175_v7, %v1088_v6  ;;  %v1174_v10 = vld [vmem:[#allocation5 + $0x14] sm:$0xf0]  ;;  %v729_v31 = vmul.f32 %v717_v29, %v717_v29  ;;  %v1273_v32 = vld [vmem:[%s1683_s15] ss:$0 sm:$0xff]  ;;  %v1144_v36 = vld [vmem:[#allocation5 + $0xec] sm:$0xf] }
  0x64   : > { %446 = vmatpush.bf16.msra.mxu0 %v1043_v34  ;;  %v758_v5 = vsel %vm757_vm0, %v756_v1, 0.0  ;;  %v1085_v11 = vor.u32 %v1174_v10, %v1084_v9  ;;  %v723_v33 = vmul.f32 %v1273_v32, %v717_v29  ;;  %v716_v34 = vld [vmem:[%s1671_s27] sm:$0xff]  ;;  %v1140_v39 = vld [vmem:[#allocation5 + $0xcc] sm:$0xf]  ;;  %v1188_v40 = vld [vmem:[#allocation5 + $0xd8] sm:$0xf0] }
  0x65   : > { %460 = vmatpush.bf16.msra.mxu1 %v1047_v37  ;;  %759 = vadd.xlane.f32.xlu1 %v758_v5  ;;  %v728_v35 = vmul.f32 %v716_v34, %v716_v34  ;;  %v1189_v37 = vld [vmem:[#allocation5 + $0xf8] sm:$0xf0]  ;;  %v1136_v41 = vld [vmem:[#allocation5 + $0xac] sm:$0xf]  ;;  %v1141_v42 = vor.u32 %v1188_v40, %v1140_v39  ;;  %vm491_vm2 = vcmp.lt.s32.totalorder %v1687_v14, 11  ;;  %v722_v5 = vmul.f32 %v1273_v32, %v716_v34  ;;  %s1190_s28 = smul.u32 24, %s1655_s8 }
  0x66   : > { %582 = vmatpush.bf16.msra.mxu2 %v1101_v51  ;;  %v1145_v38 = vor.u32 %v1189_v37, %v1144_v36  ;;  %v1132_v45 = vld [vmem:[#allocation5 + $0x8c] sm:$0xf]  ;;  %v1185_v49 = vld [vmem:[#allocation5 + $0x78] sm:$0xf0]  ;;  %v1274_v9 = vld [vmem:[#allocation7 + $0x2] ss:$0 sm:$0xff] }
  0x67   : > { %v1128_v48 = vld [vmem:[#allocation5 + $0x6c] sm:$0xf]  ;;  %v1182_v62 = vld [vmem:[#allocation5 + $0x18] sm:$0xf0]  ;;  %v1502_v40 = vmov 0.0   ;;  %s1768_s6 = scalar_lea.vmem [#allocation10], %s1190_s28 }
  0x68   : > { %447 = vmatpush.bf16.msra.mxu0 %v1035_v43  ;;  %664 = vmatpush.bf16.msra.mxu3 %v1145_v38  ;;  %v1187_v43 = vld [vmem:[#allocation5 + $0xb8] sm:$0xf0]  ;;  %v1129_v50 = vor.u32 %v1185_v49, %v1128_v48  ;;  %v1124_v51 = vld [vmem:[#allocation5 + $0x4c] sm:$0xf]  ;;  %s1191_s9 = smul.u32 24, %s1556_s22  ;;  %s869_s7 = sshll.u32 %s1768_s6, 4  ;;  %s870_s7 = int_to_ptr.vmem [resolvable:$true] %s869_s7 }
  0x69   : > { %461 = vmatpush.bf16.msra.mxu1 %v1039_v46  ;;  %v1137_v44 = vor.u32 %v1187_v43, %v1136_v41  ;;  %v1186_v46 = vld [vmem:[#allocation5 + $0x98] sm:$0xf0]  ;;  %v1120_v57 = vld [vmem:[#allocation5 + $0x2c] sm:$0xf]  ;;  %s857_s22 = scalar_lea.sflag [#allocation4], %s1655_s8  ;;  %s1438_s29 = scalar_lea.hbm %s1831_s5, 48 }
  0x6a   : > { %583 = vmatpush.bf16.msra.mxu2 %v1097_v63  ;;  %v1133_v47 = vor.u32 %v1186_v46, %v1132_v45  ;;  %v1116_v61 = vld [vmem:[#allocation5 + $0xc] sm:$0xf]  ;;  %s868_s2 = scalar_lea.hbm %s1831_s5, %s1191_s9 }
  0x6b   : > { %v1117_v63 = vor.u32 %v1182_v62, %v1116_v61  ;;  %s871_s1 = sshll.u32 %s868_s2, 4  ;;  %s872_s1 = int_to_ptr.hbm [resolvable:$true] %s871_s1 }
  0x6c   : > { %448 = vmatpush.bf16.msra.mxu0 %v1027_v52  ;;  %665 = vmatpush.bf16.msra.mxu3 %v1141_v42  ;;  %v1184_v52 = vld [vmem:[#allocation5 + $0x58] sm:$0xf0]  ;;  %s1432_s26 = sshra.s32 %s872_s1, 4  ;;  %s1433_s26 = int_to_ptr.hbm [resolvable:$true] %s1432_s26 }
  0x6d   : > { %462 = vmatpush.bf16.msra.mxu1 %v1031_v53  ;;  %v1125_v54 = vor.u32 %v1184_v52, %v1124_v51  ;;  %s1434_s16 = scalar_lea.hbm %s1433_s26, 24  ;;  %p1439_p10 = scmp.lt.s32.totalorder %s1433_s26, %s1831_s5 }
  0x6e   : > { %584 = vmatpush.bf16.msra.mxu2 %v1093_v4  ;;  %p1435_p4 = scmp.ne.s32.totalorder %s1433_s26, %s1434_s16  ;;  %p1440_p11 = scmp.lt.s32.totalorder %s1438_s29, %s1434_s16 }
  0x70   : > { %449 = vmatpush.bf16.msra.mxu0 %v1019_v58  ;;  %666 = vmatpush.bf16.msra.mxu3 %v1137_v44  ;;  %v1183_v58 = vld [vmem:[#allocation5 + $0x38] sm:$0xf0]  ;;  %p1436_p8 = pnand %p1435_p4, %p1601_p3  ;;  %p1441_p9 = por %p1440_p11, %p1439_p10 }
  0x71   : > { %463 = vmatpush.bf16.msra.mxu1 %v1023_v59  ;;  %v1121_v59 = vor.u32 %v1183_v58, %v1120_v57 }
  0x72   : > { %585 = vmatpush.bf16.msra.mxu2 %v1089_v8  ;;  %p1437_p2 = pneg %p1436_p8 }
  0x73   : > { %450 = vmatmul.bf16.vlgmr.msra.gmra.mxu0 %v1157_v60 }
  0x74   : > { %464 = vmatmul.bf16.vlgmr.msra.gmra.mxu1 %v1157_v60  ;;  %667 = vmatpush.bf16.msra.mxu3 %v1133_v47  ;;  %p1442_p12 = pnand %p1441_p9, %p1437_p2 }
  0x76   : > { %586 = vmatpush.bf16.msra.mxu2 %v1085_v11 }
  0x78   : > { %668 = vmatpush.bf16.msra.mxu3 %v1129_v50  ;;  %v1710_v50 = vshrl.u32 %v472_v12, 7 }
  0x7a   : > { %v1715_v52 = vadd.s32 8, %v1710_v50 }
  0x7c   : > { %669 = vmatpush.bf16.msra.mxu3 %v1125_v54 }
  0x80   : > { %670 = vmatpush.bf16.msra.mxu3 %v1121_v59 }
  0x84   : > { %671 = vmatpush.bf16.msra.mxu3 %v1117_v63 }
  0xd8   : > { %v760_v53 = vpop.xlane.xlu1 %759 }
  0xf0   : > { %v451_v16 = vpop.f32.mrf.mxu0 }
  0xf1   : > { %v452_v17 = vadd.f32 %v451_v16, %v352_v15  ;;  %v465_v18 = vpop.f32.mrf.mxu1 }
  0xf2   : > { %v466_v21 = vadd.f32 %v465_v18, %v353_v20 }
  0xf3   : > { %v475_v19 = vsel %vm474_vm1, %v452_v17, -inf }
  0xf4   : > { %477 = vmax.xlane.f32.xlu0 %v475_v19  ;;  %v470_v27 = vmax.f32 %v466_v21, 0.0 }
  0xf8   : > { %v453_v22 = vpop.f32.mrf.mxu0 }
  0xf9   : > { %v454_v23 = vadd.f32 %v453_v22, %v352_v15  ;;  %v467_v24 = vpop.f32.mrf.mxu1 }
  0xfa   : > { %v468_v25 = vadd.f32 %v467_v24, %v353_v20 }
  0xfb   : > { %v476_v26 = vsel %vm474_vm1, %v454_v23, -inf }
  0xfc   : > { %v471_v28 = vmax.f32 %v468_v25, 0.0  ;;  %479 = vmax.xlane.f32.xlu1 %v476_v26  ;;  %730 = vadd.xlane.f32.xlu0 %v728_v35 }
  0xfe   : > { %v510_v30 = vpack.c.bf16 %v471_v28, %v470_v27 }
 0x100   : > { %587 = vmatmul.bf16.vlgmr.msra.gmra.mxu2 %v510_v30 }
 0x104   : > { %732 = vadd.xlane.f32.xlu1 %v729_v31 }
 0x10c   : > { %726 = vadd.xlane.f32.xlu1 %v723_v33 }
 0x167   : > { %v478_v55 = vpop.xlane.xlu0 %477 }
 0x168   : > { %v481_v56 = vsub.f32 %v475_v19, %v478_v55  ;;  %v761_v19 = vadd.f32 1e-08, %v760_v53 }
 0x16a   : > { %v483_v60 = vmul.f32 1.442695, %v481_v56  ;;  %vm768_vm3 = vweird.f32 %v761_v19  ;;  %v1275_v56 = vld [vmem:[#allocation7 + $0x3] ss:$0 sm:$0xff] }
 0x16c   : > { %1276 = vpow2.f32 %v483_v60 }
 0x16f   : > { %v480_v0 = vpop.xlane.xlu1 %479  ;;  %v731_v18 = vpop.xlane.xlu0 %730 }
 0x170   : > { %v482_v1 = vsub.f32 %v476_v26, %v480_v0  ;;  %v734_v20 = vadd.f32 1e-08, %v731_v18 }
 0x172   : > { %v1277_v2 = vpop.eup %1276  ;;  %v485_v3 = vmul.f32 1.442695, %v482_v1  ;;  %vm742_vm5 = vweird.f32 %v734_v20 }
 0x173   : > { %487 = vadd.xlane.f32.xlu2 %v1277_v2  ;;  %v492_v4 = vsel %vm491_vm2, %v1277_v2, 0.0 }
 0x174   : > { %1278 = vpow2.f32 %v485_v3  ;;  %494 = vmax.xlane.f32.xlu0 %v492_v4 }
 0x175   : > { %1280 = vrsqrt.f32 %v761_v19 }
 0x176   : > { %1282 = vrsqrt.f32 %v734_v20 }
 0x177   : > { %v733_v53 = vpop.xlane.xlu1 %732 }
 0x178   : > { %v735_v57 = vadd.f32 1e-08, %v733_v53 }
 0x17a   : > { %v1279_v6 = vpop.eup %1278  ;;  %1284 = vrsqrt.f32 %v735_v57  ;;  %vm752_vm0 = vweird.f32 %v735_v57 }
 0x17b   : > { %724 = vadd.xlane.f32.xlu2 %v722_v5  ;;  %v493_v7 = vsel %vm491_vm2, %v1279_v6, 0.0  ;;  %v1281_v21 = vpop.eup %1280 }
 0x17c   : > { %496 = vmax.xlane.f32.xlu0 %v493_v7  ;;  %v1283_v22 = vpop.eup %1282  ;;  %v763_v23 = vmul.f32 %v1281_v21, %v761_v19  ;;  %vm769_vm4 = vweird.f32 %v1281_v21 }
 0x17d   : > { %v737_v24 = vmul.f32 %v1283_v22, %v734_v20  ;;  %vm743_vm6 = vweird.f32 %v1283_v22  ;;  %vm770_vm7 = vmor %vm768_vm3, %vm769_vm4 }
 0x17e   : > { %v764_v25 = vmul.f32 %v1281_v21, %v763_v23  ;;  %vm744_vm8 = vmor %vm742_vm5, %vm743_vm6 }
 0x17f   : > { %v738_v26 = vmul.f32 %v1283_v22, %v737_v24 }
 0x180   : > { %v765_v27 = vmul.f32 0.5, %v764_v25  ;;  %v1721_v62 = vpop.eup %1284 }
 0x181   : > { %v739_v28 = vmul.f32 0.5, %v738_v26  ;;  %v747_v2 = vmul.f32 %v1721_v62, %v735_v57  ;;  %vm753_vm1 = vweird.f32 %v1721_v62 }
 0x182   : > { %v766_v29 = vsub.f32 1.5, %v765_v27  ;;  %vm1733_vm3 = vmor %vm752_vm0, %vm753_vm1 }
 0x183   : > { %v588_v8 = vpop.f32.mrf.mxu2  ;;  %489 = vadd.xlane.f32.xlu2 %v1279_v6  ;;  %v740_v30 = vsub.f32 1.5, %v739_v28  ;;  %v748_v7 = vmul.f32 %v1721_v62, %v747_v2 }
 0x184   : > { %v589_v10 = vadd.f32 %v1274_v9, %v588_v8  ;;  %v767_v32 = vmul.f32 %v1281_v21, %v766_v29 }
 0x185   : > { %v741_v34 = vmul.f32 %v1283_v22, %v740_v30 }
 0x186   : > { %v593_v15 = vmax.f32 %v589_v10, 0.0  ;;  %v771_v36 = vsel %vm770_vm7, %v1281_v21, %v767_v32  ;;  %vm836_vm7 = vcmp.lt.s32.totalorder %v1687_v14, 4 }
 0x187   : > { %v745_v37 = vsel %vm744_vm8, %v1283_v22, %v741_v34  ;;  %v1697_v39 = vperm.slane %v771_v36, 0 }
 0x18b   : > { %v590_v11 = vpop.f32.mrf.mxu2 }
 0x18c   : > { %v591_v13 = vadd.f32 %v1274_v9, %v590_v11  ;;  %v749_v9 = vmul.f32 0.5, %v748_v7 }
 0x18e   : > { %v594_v16 = vmax.f32 %v591_v13, 0.0 }
 0x190   : > { %v595_v17 = vpack.c.bf16 %v594_v16, %v593_v15  ;;  %v750_v16 = vsub.f32 1.5, %v749_v9 }
 0x192   : > { %672 = vmatmul.bf16.vlgmr.msra.gmra.mxu3 %v595_v17  ;;  %v751_v26 = vmul.f32 %v1721_v62, %v750_v16 }
 0x1e6   : > { %v488_v31 = vpop.xlane.xlu2 %487 }
 0x1e7   : > { %v498_v33 = vmul.f32 0.7, %v488_v31  ;;  %v1694_v35 = vpop.xlane.xlu0 %494 }
 0x1e9   : > { %vm500_vm9 = vcmp.gt.f32.partialorder %v1694_v35, %v498_v33 }
 0x1ea   : > { %v1700_v41 = vsel %vm500_vm9, 1.0, %v1502_v40  ;;  %vm839_vm9 = vcmp.eq.s32.totalorder %v1687_v14, 4 }
 0x1eb   : > { %vm780_vm10 = vcmp.gt.f32.partialorder %v1700_v41, 0.0 }
 0x1ec   : > { %v1151_v17 = vsel %vm780_vm10, 1.0, %v1502_v40 }
 0x1ed   : > { %v829_v24 = vmax.f32 %v1151_v17, 0.0 }
 0x1ee   : > { %v725_v38 = vpop.xlane.xlu2 %724 }
 0x1ef   : > { %v772_v42 = vmul.f32 %v745_v37, %v725_v38  ;;  %v830_v36 = vrot.slane %v829_v24, 4  ;;  %v755_v38 = vsel %vm1733_vm3, %v1721_v62, %v751_v26 }
 0x1f1   : > { %v1703_v43 = vmul.f32 %v1697_v39, %v772_v42 }
 0x1f3   : > { %v786_v44 = vsel %vm780_vm10, %v1703_v43, -inf  ;;  %vm842_vm10 = vcmp.eq.s32.totalorder %v1687_v14, 5 }
 0x1f4   : > { %v789_v45 = vrot.slane %v786_v44, 4 }
 0x1f6   : > { %v790_v46 = vmax.f32 %v786_v44, %v789_v45  ;;  %v490_v21 = vpop.xlane.xlu2 %489 }
 0x1f8   : > { %v791_v47 = vrot.slane %v790_v46, 2 }
 0x1fa   : > { %v792_v48 = vmax.f32 %v790_v46, %v791_v47  ;;  %v499_v46 = vmul.f32 0.7, %v490_v21 }
 0x1fc   : > { %v793_v49 = vrot.slane %v792_v48, 1 }
 0x1fe   : > { %v1712_v51 = vmax.f32 %v792_v48, %v793_v49  ;;  %v727_v48 = vpop.xlane.xlu1 %726 }
 0x200   : > { %vm795_vm11 = vcmp.eq.f32.partialorder %v786_v44, %v1712_v51  ;;  %vm1148_vm12 = vcmp.eq.f32.partialorder %v1712_v51, -inf }
 0x201   : > { %v797_v54 = vsel %vm795_vm11, %v1710_v50, 16  ;;  %v798_v55 = vsel %vm1148_vm12, %v1715_v52, 16  ;;  %vm845_vm11 = vcmp.eq.s32.totalorder %v1687_v14, 6 }
 0x202   : > { %vm799_vm13 = vcmp.lt.s32.totalorder %v797_v54, %v798_v55 }
 0x203   : > { %v800_v12 = vsel %vm799_vm13, %v797_v54, %v798_v55 }
 0x204   : > { %v801_v61 = vrot.slane %v800_v12, 4 }
 0x206   : > { %vm802_vm14 = vcmp.lt.s32.totalorder %v800_v12, %v801_v61 }
 0x207   : > { %v803_v3 = vsel %vm802_vm14, %v800_v12, %v801_v61  ;;  %v497_v12 = vpop.xlane.xlu0 %496 }
 0x208   : > { %v804_v6 = vrot.slane %v803_v3, 2  ;;  %vm501_vm1 = vcmp.gt.f32.partialorder %v497_v12, %v499_v46 }
 0x20a   : > { %vm805_vm15 = vcmp.lt.s32.totalorder %v803_v3, %v804_v6 }
 0x20b   : > { %v806_v13 = vsel %vm805_vm15, %v803_v3, %v804_v6  ;;  %v1081_v3 = vsel %vm501_vm1, 1.0, %v1502_v40 }
 0x20c   : > { %v807_v19 = vrot.slane %v806_v13, 1 }
 0x20e   : > { %vm1737_vm5 = vcmp.lt.s32.totalorder %v806_v13, %v807_v19 }
 0x20f   : > { %v809_v45 = vsel %vm1737_vm5, %v806_v13, %v807_v19 }
 0x210   : > { %vm810_vm13 = vcmp.eq.s32.totalorder %v1710_v50, %v809_v45  ;;  %vm811_vm14 = vcmp.eq.s32.totalorder %v1715_v52, %v809_v45 }
 0x211   : > { %v1150_v50 = vsel %vm811_vm14, 1.0, %v1502_v40 }
 0x215   : > { %v673_v58 = vpop.f32.mrf.mxu3 }
 0x216   : > { %v674_v59 = vadd.f32 %v1275_v56, %v673_v58 }
 0x218   : > { %v1146_v60 = vmul.f32 -1.442695, %v674_v59 }
 0x21a   : > { %1286 = vpow2.f32 %v1146_v60 }
 0x21d   : > { %v675_v63 = vpop.f32.mrf.mxu3 }
 0x21e   : > { %v676_v0 = vadd.f32 %v1275_v56, %v675_v63  ;;  %v831_v56 = vmax.f32 %v829_v24, %v830_v36 }
 0x220   : > { %v1287_v1 = vpop.eup %1286  ;;  %v1147_v4 = vmul.f32 -1.442695, %v676_v0  ;;  %v832_v62 = vrot.slane %v831_v56, 2 }
 0x221   : > { %v684_v5 = vadd.f32 1.0, %v1287_v1 }
 0x222   : > { %1288 = vpow2.f32 %v1147_v4 }
 0x223   : > { %1290 = vrcp.f32 %v684_v5  ;;  %v697_v20 = vand.u32 2147483648, %v684_v5  ;;  %v695_v23 = vand.u32 2147483647, %v684_v5  ;;  %vm691_vm4 = vweird.f32 %v684_v5 }
 0x224   : > { %1292 = vrcp.f32 %v488_v31 }
 0x225   : > { %v698_v31 = vor.u32 1.1754944e-38, %v697_v20  ;;  %vm696_vm8 = vcmp.eq.f32.partialorder %v695_v23, 8.507059e+37 }
 0x228   : > { %v1289_v8 = vpop.eup %1288 }
 0x229   : > { %v1291_v10 = vpop.eup %1290  ;;  %v1725_v11 = vadd.f32 1.0, %v1289_v8  ;;  %v833_v8 = vmax.f32 %v831_v56, %v832_v62 }
 0x22a   : > { %v687_v15 = vmul.f32 %v1291_v10, %v684_v5  ;;  %vm692_vm2 = vweird.f32 %v1291_v10  ;;  %v1293_v25 = vpop.eup %1292 }
 0x22b   : > { %1294 = vrcp.f32 %v1725_v11  ;;  %vm693_vm6 = vmor %vm691_vm4, %vm692_vm2  ;;  %v508_v34 = vmul.f32 %v1293_v25, %v1694_v35  ;;  %v712_v47 = vand.u32 2147483648, %v1725_v11  ;;  %v710_v54 = vand.u32 2147483647, %v1725_v11 }
 0x22c   : > { %v688_v18 = vsub.f32 1.0, %v687_v15  ;;  %1296 = vrcp.f32 %v490_v21  ;;  %vm706_vm15 = vweird.f32 %v1725_v11 }
 0x22d   : > { %v713_v59 = vor.u32 1.1754944e-38, %v712_v47  ;;  %vm711_vm2 = vcmp.eq.f32.partialorder %v710_v54, 8.507059e+37 }
 0x22e   : > { %v689_v22 = vmul.f32 %v1291_v10, %v688_v18 }
 0x230   : > { %v690_v28 = vadd.f32 %v1291_v10, %v689_v22 }
 0x231   : > { %v1295_v29 = vpop.eup %1294 }
 0x232   : > { %v694_v32 = vsel %vm693_vm6, %v1291_v10, %v690_v28  ;;  %v702_v33 = vmul.f32 %v1295_v29, %v1725_v11  ;;  %vm707_vm12 = vweird.f32 %v1295_v29  ;;  %v1297_v55 = vpop.eup %1296  ;;  %v834_v11 = vrot.slane %v833_v8, 1 }
 0x233   : > { %v699_v37 = vsel %vm696_vm8, %v698_v31, %v694_v32  ;;  %vm708_vm0 = vmor %vm706_vm15, %vm707_vm12  ;;  %v509_v52 = vmul.f32 %v1297_v55, %v497_v12 }
 0x234   : > { %v837_v42 = vsel %vm836_vm7, %v699_v37, 0.0  ;;  %v703_v44 = vsub.f32 1.0, %v702_v33  ;;  %v835_v13 = vmax.f32 %v833_v8, %v834_v11 }
 0x235   : > { %v840_v35 = vsel %vm839_vm9, %v508_v34, %v837_v42 }
 0x236   : > { %v843_v49 = vsel %vm842_vm10, %v1700_v41, %v840_v35  ;;  %v704_v53 = vmul.f32 %v1295_v29, %v703_v44  ;;  %v773_v41 = vmul.f32 %v755_v38, %v727_v48  ;;  %vm852_vm3 = vcmp.gt.f32.partialorder %v835_v13, 0.0 }
 0x237   : > { %v846_v57 = vsel %vm845_vm11, %v1703_v43, %v843_v49  ;;  %v1149_v43 = vsel %vm810_vm13, 1.0, %v1502_v40  ;;  %v853_v18 = vsel %vm852_vm3, %v1712_v51, 0.0 }
 0x238   : > { %v705_v58 = vadd.f32 %v1295_v29, %v704_v53  ;;  %848 = vst [vmem:[%s1768_s6] sm:$0xff] %v846_v57  ;;  %v816_v63 = vmul.f32 %v1149_v43, %v699_v37  ;;  %v776_v2 = vmul.f32 %v1697_v39, %v773_v41 }
 0x23a   : > { %v709_v60 = vsel %vm708_vm0, %v1295_v29, %v705_v58 }
 0x23b   : > { %v714_v61 = vsel %vm711_vm2, %v713_v59, %v709_v60 }
 0x23c   : > { %v817_v0 = vmul.f32 %v1150_v50, %v714_v61  ;;  %v838_v1 = vsel %vm836_vm7, %v714_v61, 0.0 }
 0x23d   : > { %v841_v4 = vsel %vm839_vm9, %v509_v52, %v838_v1 }
 0x23e   : > { %v818_v5 = vadd.f32 %v817_v0, %v816_v63  ;;  %v844_v6 = vsel %vm842_vm10, %v1081_v3, %v841_v4 }
 0x23f   : > { %v847_v7 = vsel %vm845_vm11, %v776_v2, %v844_v6 }
 0x240   : > { %v819_v9 = vrot.slane %v818_v5, 4  ;;  %849 = vst [vmem:[%s1768_s6 + $0x8] sm:$0xff] %v847_v7 }
 0x242   : > { %v820_v10 = vadd.f32 %v819_v9, %v818_v5 }
 0x244   : > { %v821_v39 = vrot.slane %v820_v10, 2 }
 0x246   : > { %v822_v40 = vadd.f32 %v821_v39, %v820_v10 }
 0x248   : > { %v823_v15 = vrot.slane %v822_v40, 1 }
 0x24a   : > { %v824_v16 = vadd.f32 %v823_v15, %v822_v40 }
 0x24c   : > { %v850_v17 = vsel %vm836_vm7, %v824_v16, 0.0 }
 0x24d   : > { %v851_v19 = vsel %vm839_vm9, %v835_v13, %v850_v17 }
 0x24e   : > { %v854_v20 = vsel %vm842_vm10, %v853_v18, %v851_v19 }
 0x24f   : > { %855 = vst [vmem:[%s1768_s6 + $0x10] sm:$0xff] %v854_v20 }
 0x250   : > { %1445 = shalt.err (!%p1442_p12)
}
 0x251   : > { %s1503_s8 = smov 128   ;;  %s1504_s24 = smov 8  }
 0x252   : > { %1204 = dma.vmem_to_hbm [thread:$0]  (%p1601_p3), %s870_s7, 384, %s872_s1, %s857_s22, %s1503_s8, %s1503_s8, %s1504_s24  }
 0x253 PF: > { %s886_s30 = sand.u32 1, %s1480_s18   ;;  %p1848_p13 = scmp.ge.s32.totalorder %s1492_s21, 2 }
 0x254   : > { %s887_s13 = scalar_lea.sflag [#allocation4], %s886_s30 }
 0x255   : > { %p1221_p0 = pnand %p1848_p13, %p1570_p6 }
 0x257   : > { %p1222_p5 = pneg %p1221_p0 }
 0x259   : > { %1475 = dma.done.wait (%p1222_p5), %s887_s13, 384  }
 0x25a   : > { %1477 = vsyncadd (%p1222_p5), %s887_s13, 4294966912  ;;  %s1849_s15 = sld [smem:[#allocation15_spill]]  ;;  %p22_p7 = scmp.ge.s32.totalorder %s1591_s14, 4  }
 0x25b   : > { %s1850_s18 = smov %s1484_s19  ;;  %s1851_s19 = smov %s1488_s20 }
 0x25c   : > { %s1853_s21 = smov %s1591_s14  ;;  %24 = sbr.rel (!%p22_p7) target bundleno = 12 (0xc), region = 109 }
 0x260   : > { %s1852_s20 = smov %s1849_s15 }
 0x261   :  { %893 = vsyncpa [#allocation3], 1 }
 0x262   :  { %895 = vsyncpa [#allocation3 + $0x1], 1 }
 0x263   :  { %896 = vsyncpa [#allocation6], 1 }
 0x264   :  { %897 = vsyncpa [#allocation9], 1 }
 0x265   :  { %899 = vsyncpa [#allocation9 + $0x1], 1 }
 0x266   :  { %900 = vsyncpa [#allocation4], 1 }
 0x267   :  { %902 = vsyncpa [#allocation4 + $0x1], 1 }

</bundles_post_ra>
